<compile_context>
chip_gen: v7x
topology: tpu7x:2x2x1
jax: 0.10.0
libtpu: 0.0.40
codegen_flags: <defaults>
</compile_context>

<pallas_src>
import functools
import math

import jax
import jax.numpy as jnp
from jax.experimental import pallas as pl
from jax.experimental.pallas import tpu as pltpu


def _fake_quant_kernel(x_ref, scale_ref, inv_scale_ref, zp_ref, o_ref, *,
                       quant_min, quant_max):
    # x_ref: (t_rows, t_lane) native dtype; params: (t_rows, 1) float32,
    # broadcasting over lanes.
    x = x_ref[...].astype(jnp.float32)
    scale = scale_ref[...]
    inv_scale = inv_scale_ref[...]
    zp = zp_ref[...]
    q = jnp.round(x * inv_scale + zp)            # round half-to-even == nearbyint
    q = jnp.clip(q, float(quant_min), float(quant_max))
    o_ref[...] = ((q - zp) * scale).astype(o_ref.dtype)


def _choose_fold(C, L, itemsize, rows_mult):
    """Pick a fold factor k: reshape lanes into sublanes so C*k is a multiple
    of the dtype-aware vreg row count, without degrading DMA row length."""
    target = 4 << 20
    small = 2 << 20
    slab_bytes = C * L * itemsize

    def _ok(cand, mult):
        if L % cand != 0 or (C * cand) % mult != 0:
            return False
        if slab_bytes > small:
            # This slab will be lane-tiled; keep contiguous rows >= 512 B.
            crows = C * cand
            l2 = L // cand
            max_tile = max(128, (target // max(crows * itemsize, 1)) // 128 * 128)
            if min(max_tile, l2) * itemsize < 512:
                return False
        return True

    if C % rows_mult == 0 or L <= 1:
        return 1
    for cand in range(2, 65):
        if _ok(cand, rows_mult):
            return cand
    # Fall back to the base 8-row requirement (still helps f32-packing).
    if rows_mult > 8 and C % 8 != 0:
        for cand in range(2, 65):
            if _ok(cand, 8):
                return cand
    return 1  # no valid fold: still correct (full-extent rows), just padded vregs


def _choose_tiling(Crows, L2, itemsize, rows_mult):
    """Pick (t_rows, n_rows, t_lane, n_lane).  Large slabs are always split
    into >= 2 grid steps so the pipeline can overlap DMA and compute."""
    target = 4 << 20          # ~4 MiB per x block
    small = 2 << 20           # below this a single full-extent block is fine
    slab_bytes = Crows * L2 * itemsize

    # ---- lane tiling ----
    if slab_bytes <= small or L2 < 256:
        t_lane, n_lane = L2, 1
    else:
        max_tile = max(128, (target // max(Crows * itemsize, 1)) // 128 * 128)
        if L2 % 128 == 0:
            # Largest multiple-of-128 divisor of L2 that fits the budget and
            # leaves >= 2 chunks -> lane-dense, unmasked stores everywhere.
            n128 = L2 // 128
            best = 1
            for d in range(1, n128):
                if n128 % d == 0 and 128 * d <= max_tile:
                    best = d
            t_lane = 128 * best
            n_lane = L2 // t_lane
        else:
            # L2 not a multiple of 128: accept one ragged tail block.
            t_lane = min(max_tile, max(128, (L2 // 2) // 128 * 128))
            n_lane = -(-L2 // t_lane)

    # ---- sublane (row) tiling, only if lanes alone could not split a big slab ----
    block_bytes = Crows * t_lane * itemsize
    if n_lane == 1 and block_bytes > small and Crows >= 2 * rows_mult:
        rows_target = (target // max(t_lane * itemsize, 1)) // rows_mult * rows_mult
        rows_half = (Crows // 2) // rows_mult * rows_mult
        t_rows = max(rows_mult, min(max(rows_target, rows_mult), rows_half))
        n_rows = -(-Crows // t_rows)
    else:
        t_rows, n_rows = Crows, 1
    return t_rows, n_rows, t_lane, n_lane


def per_channel_fake_quant(x, scale, zero_point, quant_min, quant_max, axis):
    """JAX/Pallas equivalent of torch.fake_quantize_per_channel_affine."""
    orig_dtype = x.dtype
    ndim = x.ndim
    axis = axis % ndim
    shape = x.shape

    C = int(shape[axis])
    B = int(math.prod(shape[:axis]))
    L = int(math.prod(shape[axis + 1:]))

    itemsize = jnp.dtype(orig_dtype).itemsize
    rows_mult = {4: 8, 2: 16, 1: 32}.get(itemsize, 8)   # dtype-aware vreg packing

    # Tiny per-channel parameter prep (C elements - negligible).
    scale_f = scale.astype(jnp.float32)
    inv_scale_f = 1.0 / scale_f
    zp_f = zero_point.astype(jnp.float32)

    # Fold lane chunks into sublanes so the row count fully packs a vreg.
    k = _choose_fold(C, L, itemsize, rows_mult)
    Crows = C * k
    L2 = L // k

    # Pure reshape (contiguous, row-major preserved) - no HBM transpose.
    x3 = x.reshape(B, Crows, L2)
    scale_rows = jnp.repeat(scale_f, k).reshape(Crows, 1)
    inv_rows = jnp.repeat(inv_scale_f, k).reshape(Crows, 1)
    zp_rows = jnp.repeat(zp_f, k).reshape(Crows, 1)

    t_rows, n_rows, t_lane, n_lane = _choose_tiling(Crows, L2, itemsize, rows_mult)

    # Derived VMEM budget: 2-deep double buffers on x and out + params + headroom.
    x_block_bytes = t_rows * t_lane * itemsize
    param_bytes = 3 * t_rows * 4
    vmem_need = 2 * (2 * x_block_bytes) + 2 * param_bytes
    vmem_limit = int(min(max(vmem_need + (8 << 20), 16 << 20), 48 << 20))

    kernel = functools.partial(
        _fake_quant_kernel, quant_min=quant_min, quant_max=quant_max
    )

    out3 = pl.pallas_call(
        kernel,
        out_shape=jax.ShapeDtypeStruct((B, Crows, L2), orig_dtype),
        grid_spec=pltpu.PrefetchScalarGridSpec(
            num_scalar_prefetch=0,
            grid=(B, n_rows, n_lane),
            in_specs=[
                pl.BlockSpec((None, t_rows, t_lane), lambda b, r, j: (b, r, j)),
                pl.BlockSpec((t_rows, 1), lambda b, r, j: (r, 0)),
                pl.BlockSpec((t_rows, 1), lambda b, r, j: (r, 0)),
                pl.BlockSpec((t_rows, 1), lambda b, r, j: (r, 0)),
            ],
            out_specs=pl.BlockSpec((None, t_rows, t_lane),
                                   lambda b, r, j: (b, r, j)),
        ),
        compiler_params=pltpu.CompilerParams(
            dimension_semantics=("parallel", "parallel", "parallel"),
            vmem_limit_bytes=vmem_limit,
        ),
    )(x3, scale_rows, inv_rows, zp_rows)

    # Reshape back is again a pure view.
    return out3.reshape(shape)


def _reference(x, scale, zero_point, quant_min, quant_max, axis):
    """Pure-JAX reference for correctness checking (f32 math)."""
    bshape = [1] * x.ndim
    bshape[axis] = x.shape[axis]
    s = scale.astype(jnp.float32).reshape(bshape)
    z = zero_point.astype(jnp.float32).reshape(bshape)
    xf = x.astype(jnp.float32)
    q = jnp.clip(jnp.round(xf / s + z), quant_min, quant_max)
    return (q - z) * s


if __name__ == "__main__":
    key = jax.random.PRNGKey(0)
    kx, ks, kz = jax.random.split(key, 3)

    N, C, H, W = 2, 4, 16, 16
    axis = 1
    quant_min, quant_max = -128, 127

    x = jax.random.normal(kx, (N, C, H, W), dtype=jnp.float32) * 3.0
    scale = jax.random.uniform(ks, (C,), minval=0.01, maxval=0.1,
                               dtype=jnp.float32)
    zero_point = jax.random.randint(kz, (C,), -10, 10, dtype=jnp.int32)

    # float32 path (exercises f32 fold: 4 channels -> 8 sublane rows)
    out = per_channel_fake_quant(x, scale, zero_point,
                                 quant_min, quant_max, axis)
    out = jax.block_until_ready(out)
    ref = _reference(x, scale, zero_point, quant_min, quant_max, axis)
    assert out.shape == x.shape and out.dtype == x.dtype
    assert jnp.allclose(out, ref, atol=1e-6, rtol=1e-6), "f32 mismatch vs reference"

    # bfloat16 path (exercises the dtype-aware fold: 4 channels -> 16 rows)
    x_bf = x.astype(jnp.bfloat16)
    out_bf = per_channel_fake_quant(x_bf, scale, zero_point,
                                    quant_min, quant_max, axis)
    out_bf = jax.block_until_ready(out_bf)
    ref_bf = _reference(x_bf, scale, zero_point, quant_min, quant_max,
                        axis).astype(jnp.bfloat16)
    assert out_bf.shape == x_bf.shape and out_bf.dtype == x_bf.dtype
    assert jnp.allclose(out_bf.astype(jnp.float32),
                        ref_bf.astype(jnp.float32), atol=5e-2), \
        "bf16 mismatch vs reference"

    print("KERNEL_OK")
</pallas_src>

<mosaic_0001>
module attributes {stable_mosaic.version = 11 : i64} {
  func.func @_fake_quant_kernel(%arg0: i32, %arg1: i32, %arg2: i32, %arg3: memref<1x8x128xf32, #tpu.memory_space<vmem>>, %arg4: memref<8x1xf32, #tpu.memory_space<vmem>>, %arg5: memref<8x1xf32, #tpu.memory_space<vmem>>, %arg6: memref<8x1xf32, #tpu.memory_space<vmem>>, %arg7: memref<1x8x128xf32, #tpu.memory_space<vmem>>) attributes {dimension_semantics = [#tpu.dimension_semantics<parallel>, #tpu.dimension_semantics<parallel>, #tpu.dimension_semantics<parallel>], iteration_bounds = array<i64: 2, 1, 1>, scalar_prefetch = 0 : i64, scratch_operands = 0 : i64, tpu.core_type = #tpu.core_type<tc>, window_params = [{transform_indices = @transform_0, window_bounds = array<i64: 1, 8, 128>}, {transform_indices = @transform_1, window_bounds = array<i64: 8, 1>}, {transform_indices = @transform_2, window_bounds = array<i64: 8, 1>}, {transform_indices = @transform_3, window_bounds = array<i64: 8, 1>}, {transform_indices = @transform_4, window_bounds = array<i64: 1, 8, 128>}]} {
    %c0 = arith.constant 0 : index
    %c0_0 = arith.constant 0 : index
    %c0_1 = arith.constant 0 : index
    %0 = vector.load %arg3[%c0, %c0_0, %c0_1] : memref<1x8x128xf32, #tpu.memory_space<vmem>>, vector<1x8x128xf32>
    %1 = vector.shape_cast %0 : vector<1x8x128xf32> to vector<8x128xf32>
    %c0_2 = arith.constant 0 : index
    %c0_3 = arith.constant 0 : index
    %2 = vector.load %arg4[%c0_2, %c0_3] : memref<8x1xf32, #tpu.memory_space<vmem>>, vector<8x1xf32>
    %c0_4 = arith.constant 0 : index
    %c0_5 = arith.constant 0 : index
    %3 = vector.load %arg5[%c0_4, %c0_5] : memref<8x1xf32, #tpu.memory_space<vmem>>, vector<8x1xf32>
    %c0_6 = arith.constant 0 : index
    %c0_7 = arith.constant 0 : index
    %4 = vector.load %arg6[%c0_6, %c0_7] : memref<8x1xf32, #tpu.memory_space<vmem>>, vector<8x1xf32>
    %5 = vector.broadcast %3 : vector<8x1xf32> to vector<8x128xf32>
    %6 = arith.mulf %1, %5 : vector<8x128xf32>
    %7 = vector.broadcast %4 : vector<8x1xf32> to vector<8x128xf32>
    %8 = arith.addf %6, %7 : vector<8x128xf32>
    %9 = math.roundeven %8 : vector<8x128xf32>
    %cst = arith.constant -1.280000e+02 : f32
    %cst_8 = arith.constant 1.270000e+02 : f32
    %10 = vector.broadcast %cst : f32 to vector<8x128xf32>
    %11 = arith.maximumf %10, %9 : vector<8x128xf32>
    %12 = vector.broadcast %cst_8 : f32 to vector<8x128xf32>
    %13 = arith.minimumf %12, %11 : vector<8x128xf32>
    %14 = vector.broadcast %4 : vector<8x1xf32> to vector<8x128xf32>
    %15 = arith.subf %13, %14 : vector<8x128xf32>
    %16 = vector.broadcast %2 : vector<8x1xf32> to vector<8x128xf32>
    %17 = arith.mulf %15, %16 : vector<8x128xf32>
    %c0_9 = arith.constant 0 : index
    %c0_10 = arith.constant 0 : index
    %c0_11 = arith.constant 0 : index
    %18 = vector.load %arg7[%c0_9, %c0_10, %c0_11] : memref<1x8x128xf32, #tpu.memory_space<vmem>>, vector<1x8x128xf32>
    %19 = vector.shape_cast %18 : vector<1x8x128xf32> to vector<8x128xf32>
    %20 = vector.shape_cast %17 : vector<8x128xf32> to vector<1x8x128xf32>
    tpu.vector_store %arg7[%c0_9, %c0_10, %c0_11], %20 {strides = array<i32>} : memref<1x8x128xf32, #tpu.memory_space<vmem>>, vector<1x8x128xf32>,
    return
  }
  func.func @transform_0(%arg0: i32, %arg1: i32, %arg2: i32) -> (i32, i32, i32) {
    %c0_i32 = arith.constant 0 : i32
    return %arg0, %arg1, %arg2 : i32, i32, i32
  }
  func.func @transform_1(%arg0: i32, %arg1: i32, %arg2: i32) -> (i32, i32) {
    %c0_i32 = arith.constant 0 : i32
    %c0_i32_0 = arith.constant 0 : i32
    return %arg1, %c0_i32 : i32, i32
  }
  func.func @transform_2(%arg0: i32, %arg1: i32, %arg2: i32) -> (i32, i32) {
    %c0_i32 = arith.constant 0 : i32
    %c0_i32_0 = arith.constant 0 : i32
    return %arg1, %c0_i32 : i32, i32
  }
  func.func @transform_3(%arg0: i32, %arg1: i32, %arg2: i32) -> (i32, i32) {
    %c0_i32 = arith.constant 0 : i32
    %c0_i32_0 = arith.constant 0 : i32
    return %arg1, %c0_i32 : i32, i32
  }
  func.func @transform_4(%arg0: i32, %arg1: i32, %arg2: i32) -> (i32, i32, i32) {
    %c0_i32 = arith.constant 0 : i32
    return %arg0, %arg1, %arg2 : i32, i32, i32
  }
}

</mosaic_0001>

<bundles_post_ra>
// kernel: tpu_custom_call.1
= control target key start
LH: loop header
LB: loop body
LE: loop exit
PB: predicated region body
PF: predicated region fallthrough
CT: control target
= control target key end

     0   :  { %9 = vsyncpa [#allocation3], 0  ;;  %s756_s0 = inlined_call_operand.vmem [shape: f32[2,8,128], index: 0, kind: input, shape index: {}]   ;;  %s757_s1 = inlined_call_operand.vmem [shape: f32[8,1], index: 1, kind: input, shape index: {}]   ;;  %s758_s2 = inlined_call_operand.vmem [shape: f32[8,1], index: 2, kind: input, shape index: {}]   ;;  %s759_s3 = inlined_call_operand.vmem [shape: f32[8,1], index: 3, kind: input, shape index: {}]   ;;  %s760_s4 = inlined_call_operand.hbm [shape: f32[2,8,128], index: 4, kind: output, shape index: {}]  }
   0x1   :  { %11 = vsyncpa [#allocation3 + $0x1], 0  ;;  %s635_s15 = smov 0   ;;  %s637_s16 = smov 0  }
   0x2   :  { %s639_s17 = smov 0   ;;  %s641_s18 = smov 0  }
   0x3   :  { %s643_s19 = smov 0   ;;  %s645_s20 = smov 0  }
   0x4 LB: > { %s455_s21 = sadd.s32 4294967295, %s606_s20   ;;  %s456_s22 = sadd.s32 4294967294, %s606_s20   ;;  %s606_s20 = sphi %s645_s20, %s17_s20   ;;  %s602_s19 = sphi %s643_s19, %s767_s19   ;;  %s598_s18 = sphi %s641_s18, %s766_s18   ;;  %s594_s17 = sphi %s639_s17, %s765_s17   ;;  %s590_s16 = sphi %s637_s16, %s764_s16   ;;  %s586_s15 = sphi %s635_s15, %s763_s15  }
   0x5   : > { %s36_s23 = sadd.s32 1, %s602_s19  ;;  %s155_s24 = sadd.s32 1, %s594_s17 }
   0x6   : > { %p38_p0 = scmp.ge.s32.totalorder %s36_s23, 2  ;;  %p165_p1 = scmp.ne.s32.totalorder %s594_s17, %s590_s16 }
   0x7   : > { %p166_p2 = scmp.eq.s32.totalorder %s455_s21, 1  ;;  %p171_p3 = scmp.ne.s32.totalorder %s590_s16, %s586_s15 }
   0x8   : > { %s769_s23 = smov (%p38_p0, %s36_s23), 0  ;;  %p172_p5 = scmp.eq.s32.totalorder %s456_s22, 1 }
   0x9   : > { %p675_p4 = por %p166_p2, %p165_p1  ;;  %s148_s26 = ssub.s32 %s602_s19, %s769_s23 }
   0xa   : > { %p462_p6 = scmp.ge.s32.totalorder %s606_s20, 1  ;;  %p153_p7 = scmp.eq.s32.totalorder %s148_s26, 0 }
   0xb   : > { %p682_p8 = por %p172_p5, %p171_p3  ;;  %p224_p9 = scmp.lt.s32.totalorder %s606_s20, 3 }
   0xc   : > { %s688_s28 = scalar_select %p153_p7, %s594_s17, %s155_s24  }
   0xd   : > { %p225_p10 = pnand %p462_p6, %p224_p9 }
   0xe   : > { %v291_v0 = vld [vmem:[%s758_s2] sm:$0xff] (!%p225_p10)  ;;  %v608_v2 = vmov (!%p225_p10), 0   ;;  %p267_p11 = scmp.lt.s32.totalorder (!%p225_p10), %s598_s18, 1  ;;  %s264_s14 = sand.u32 (!%p225_p10), 1, %s590_s16  }
   0xf   : > { %228 = sbr.rel (%p225_p10) target bundleno = 174 (0xae), region = 36  ;;  %v290_v1 = vld [vmem:[%s757_s1] sm:$0xff] (!%p225_p10)  ;;  %526 = vset.pattern.permute.xlu0 (!%p225_p10), %v608_v2  ;;  %527 = vset.pattern.permute.xlu1 (!%p225_p10), %v608_v2  ;;  %s463_s21 = sshll.u32 (!%p225_p10), %s264_s14, 3 }
  0x10   : > { %295 = vperm.xlu0 (!%p225_p10), %526, %v291_v0   ;;  %311 = vperm.xlu1 (!%p225_p10), %527, %v290_v1   ;;  %v292_v3 = vld [vmem:[%s759_s3] sm:$0xff] (!%p225_p10)  ;;  %s466_s22 = sshll.u32 (!%p225_p10), %s598_s18, 7  ;;  %s266_s24 = scalar_lea.vmem (!%p225_p10), [#allocation2], %s463_s21 }
  0x11   : > { %s332_s26 = sshll.u32 (!%p225_p10), %s266_s24, 4  ;;  %s709_s5 = scalar_lea.hbm (!%p225_p10), %s760_s4, %s466_s22  ;;  %s711_s26 = int_to_ptr.vmem [resolvable:$true] %s332_s26 }
  0x12   : > { %s317_s6 = scalar_lea.sflag (!%p225_p10), [#allocation3], %s264_s14  ;;  %s528_s7 = scalar_lea.vmem (!%p225_p10), %s711_s26, 128 }
  0x13   : > { %p529_p12 = scmp.ne.s32.totalorder (!%p225_p10), %s711_s26, %s528_s7 }
  0x14   : > { %301 = vperm.xlu0 (!%p225_p10), %526, %v292_v3  }
  0x15   : > { %p530_p13 = pnand (!%p225_p10), %p529_p12, %p675_p4 }
  0x16   : > { %s268_s9 = scalar_select %p267_p11, %s598_s18, 1 }
  0x17   : > { %p531_p0 = pneg %p530_p13  ;;  %s609_s18 = smov [#allocation2]  }
  0x18   : > { %s464_s10 = sshll.u32 %s268_s9, 3  ;;  %s532_s8 = sshll.u32 %s609_s18, 4  ;;  %s533_s8 = int_to_ptr.vmem [resolvable:$false] %s532_s8 }
  0x19   : > { %s276_s13 = scalar_lea.vmem %s756_s0, %s464_s10  ;;  %s534_s9 = scalar_lea.vmem %s533_s8, 256 }
  0x1a   : > { %v289_v5 = vld [vmem:[%s276_s13] sm:$0xff]  ;;  %p535_p1 = scmp.lt.s32.totalorder %s711_s26, %s533_s8  ;;  %p536_p2 = scmp.lt.s32.totalorder %s534_s9, %s528_s7 }
  0x1c   : > { %p537_p3 = por %p536_p2, %p535_p1 }
  0x1e   : > { %p538_p5 = pnand %p537_p3, %p531_p0 }
  0x8f   : > { %v296_v4 = vpop.permute.xlu0 %295  ;;  %v312_v12 = vpop.permute.xlu1 %311 }
  0x90   : > { %v298_v6 = vmul.f32 %v296_v4, %v289_v5 }
  0x93   : > { %v302_v7 = vpop.permute.xlu0 %301 }
  0x94   : > { %v304_v8 = vadd.f32 %v302_v7, %v298_v6 }
  0x96   : > { %v469_v9 = vround.rtne.f32 %v304_v8 }
  0x98   : > { %v306_v10 = vmax.f32 %v469_v9, -128.0 }
  0x9a   : > { %v307_v11 = vmin.f32 %v306_v10, 127.0 }
  0x9c   : > { %v308_v13 = vsub.f32 %v307_v11, %v302_v7 }
  0x9e   : > { %v314_v14 = vmul.f32 %v312_v12, %v308_v13 }
  0xa0   : > { %315 = vst [vmem:[%s266_s24] sm:$0xff] %v314_v14 }
  0xa1   : > { %541 = shalt.err (!%p538_p5)
}
  0xa2   : > { %s542_s10 = scalar_lea.hbm %s709_s5, 128  ;;  %s546_s13 = scalar_lea.hbm %s760_s4, 256 }
  0xa3   : > { %p543_p6 = scmp.ne.s32.totalorder %s709_s5, %s542_s10  ;;  %p547_p10 = scmp.lt.u32.totalorder %s709_s5, %s760_s4 }
  0xa4   : > { %p548_p11 = scmp.lt.u32.totalorder %s546_s13, %s542_s10  ;;  %p550_p13 = scmp.lt.u32.totalorder %s542_s10, %s709_s5 }
  0xa5   : > { %p544_p7 = pnand %p543_p6, %p675_p4 }
  0xa6   : > { %p549_p12 = por %p548_p11, %p547_p10 }
  0xa7   : > { %p545_p9 = pneg %p544_p7 }
  0xa8   : > { %p551_p0 = por %p550_p13, %p549_p12 }
  0xaa   : > { %p552_p1 = pnand %p551_p0, %p545_p9 }
  0xac   : > { %555 = shalt.err (!%p552_p1)
}
  0xad   : > { %470 = dma.vmem_to_hbm [thread:$0]  (%p675_p4), %s711_s26, 128, %s709_s5, %s317_s6  }
  0xae PF: > { %p476_p2 = scmp.ge.s32.totalorder %s606_s20, 2  ;;  %s344_s22 = sand.u32 1, %s586_s15  }
  0xaf   : > { %s345_s24 = scalar_lea.sflag [#allocation3], %s344_s22 }
  0xb0   : > { %p473_p3 = pnand %p476_p2, %p682_p8 }
  0xb2   : > { %581 = dma.done.wait (!%p473_p3), %s345_s24, 128  }
  0xb3   : > { %583 = vsyncadd (!%p473_p3), %s345_s24, 4294967168  ;;  %s17_s20 = sadd.s32 1, %s606_s20   ;;  %s763_s15 = smov %s590_s16 }
  0xb4   : > { %p14_p5 = scmp.ge.s32.totalorder %s17_s20, 4   ;;  %s764_s16 = smov %s594_s17 }
  0xb5   : > { %s765_s17 = smov %s688_s28  ;;  %s766_s18 = smov %s602_s19 }
  0xb6   : > { %s767_s19 = smov %s769_s23  ;;  %16 = sbr.rel (!%p14_p5) target bundleno = 4 (0x4), region = 80 }
  0xbd   :  { %350 = vsyncpa [#allocation3], 1 }
  0xbe   :  { %352 = vsyncpa [#allocation3 + $0x1], 1 }

</bundles_post_ra>
